<compile_context>
chip_gen: v6e
topology: v6e:2x2x1
jax: 0.10.0
libtpu: 0.0.40
codegen_flags: <defaults>
</compile_context>

<pallas_src>
import functools

import jax
import jax.numpy as jnp
from jax import lax
from jax.experimental import pallas as pl
from jax.experimental.pallas import tpu as pltpu


def _cdiv(a, b):
    return -(-a // b)


def _default_tile_rows(itemsize, lanes):
    """Pick ~2-4 MiB per input block while staying inside the default scoped
    VMEM budget with 2 inputs x 2 pipeline buffers (16 MiB v5e, 32 MiB v6e/v7x)."""
    try:
        kind = jax.devices()[0].device_kind.lower()
    except Exception:  # conservative fallback
        kind = ""
    if ("v6" in kind) or ("v7" in kind):
        target_bytes = 4 << 20   # 4 MiB/input -> 16 MiB pipelined
    else:
        target_bytes = 2 << 20   # 2 MiB/input ->  8 MiB pipelined (safe on v5e)
    rows = target_bytes // (lanes * itemsize)
    # Multiple of 32 rows: valid sublane packing for f32 / bf16 / int8 inputs.
    return max(32, (rows // 32) * 32)


def _mse_kernel(x_ref, y_ref, o_ref, acc_ref, *, scale, rows, tile_rows,
                steps_per_slice, mask_from_block):
    """Accumulate sum((x - y)^2) for one parallel slice of the row blocks."""
    c = pl.program_id(0)   # parallel slice (maps to a TensorCore on multi-TC chips)
    i = pl.program_id(1)   # sequential reduction step within the slice

    @pl.when(i == 0)
    def _init():
        acc_ref[c] = jnp.zeros(acc_ref.shape[1:], acc_ref.dtype)

    x = x_ref[...].astype(jnp.float32)
    y = y_ref[...].astype(jnp.float32)
    d = x - y
    sq = d * d

    tr, lanes = sq.shape

    def _partial(v):
        # VALU-only partial reduction into the vreg-shaped (8, lanes) accumulator.
        return v.reshape(tr // 8, 8, lanes).sum(axis=0)

    b = c * steps_per_slice + i   # logical row-block index for this step

    @pl.when(b < mask_from_block)
    def _full_block():
        acc_ref[c] = acc_ref[c] + _partial(sq)

    @pl.when(b >= mask_from_block)
    def _ragged_block():
        # Last (or duplicated-overflow) block: zero rows past the true row count.
        valid = rows - b * tile_rows                   # may be <= 0 (fully masked)
        row_ids = lax.broadcasted_iota(jnp.int32, sq.shape, 0)
        acc_ref[c] = acc_ref[c] + _partial(jnp.where(row_ids < valid, sq, 0.0))

    @pl.when(i == steps_per_slice - 1)
    def _finish():
        # Single cross-lane/cross-sublane reduce per slice, once at the end.
        o_ref[...] = (jnp.sum(acc_ref[c]) * scale).reshape(1, 1, 1)


def mse_pallas(x, y, normalization=True, tile_rows=None, lanes=128):
    """mean((scale(x) - scale(y))**2) with scale(t) = ((t+1)/2)*255 (or t*255)."""
    assert x.shape == y.shape, "MSELoss requires matching shapes"
    n_total = x.size

    # (x+1)/2*255 - (y+1)/2*255 == (x - y) * 127.5; fold constant^2 / N once.
    mult = 127.5 if normalization else 255.0
    scale = (mult * mult) / float(n_total)

    xf = x.reshape(-1)
    yf = y.reshape(-1)

    rows = n_total // lanes
    rem = n_total - rows * lanes

    # Sub-128-element tail (rare): tiny wrapper-side reduction, true-count scale.
    tail = None
    if rem:
        dt = (xf[rows * lanes:].astype(jnp.float32)
              - yf[rows * lanes:].astype(jnp.float32))
        tail = jnp.sum(dt * dt) * scale

    if rows == 0:
        return tail if tail is not None else jnp.float32(0.0)

    if rem:
        # Unaligned edge case only: take the lane-aligned prefix.
        xf = xf[:rows * lanes]
        yf = yf[:rows * lanes]
    # Lane-dense slab; for aligned contiguous inputs this reshape is a free bitcast.
    x2 = xf.reshape(rows, lanes)
    y2 = yf.reshape(rows, lanes)

    itemsize = jnp.dtype(x.dtype).itemsize
    sub = max(8, 32 // max(1, itemsize))   # sublane-packing multiple for this dtype

    if tile_rows is None:
        tile_rows = _default_tile_rows(itemsize, lanes)
    tile_rows = min(tile_rows, _cdiv(rows, sub) * sub)
    tile_rows = max(sub, (tile_rows // sub) * sub)

    num_blocks = _cdiv(rows, tile_rows)
    ragged = (rows % tile_rows) != 0
    mask_from_block = (num_blocks - 1) if ragged else num_blocks

    # Split blocks across 2 slices (v7x has 2 TensorCores; harmless elsewhere).
    num_slices = 2 if num_blocks >= 2 else 1
    steps_per_slice = _cdiv(num_blocks, num_slices)

    def in_map(c, i):
        b = c * steps_per_slice + i
        # Clamp a possibly overflowing logical block index; the kernel's row mask
        # zeroes any contribution from blocks past the true data.
        return (jnp.minimum(b, num_blocks - 1), 0)

    kernel = functools.partial(
        _mse_kernel, scale=scale, rows=rows, tile_rows=tile_rows,
        steps_per_slice=steps_per_slice, mask_from_block=mask_from_block)

    partials = pl.pallas_call(
        kernel,
        out_shape=jax.ShapeDtypeStruct((num_slices, 1, 1), jnp.float32),
        grid_spec=pltpu.PrefetchScalarGridSpec(
            num_scalar_prefetch=0,
            grid=(num_slices, steps_per_slice),
            in_specs=[
                pl.BlockSpec((tile_rows, lanes), in_map),
                pl.BlockSpec((tile_rows, lanes), in_map),
            ],
            out_specs=pl.BlockSpec((1, 1, 1), lambda c, i: (c, 0, 0)),
            scratch_shapes=[pltpu.VMEM((num_slices, 8, lanes), jnp.float32)],
        ),
        compiler_params=pltpu.CompilerParams(
            dimension_semantics=("parallel", "arbitrary"),
        ),
    )(x2, y2)

    result = jnp.sum(partials)
    if tail is not None:
        result = result + tail
    return result


if __name__ == "__main__":
    key = jax.random.PRNGKey(0)
    kx, ky = jax.random.split(key)
    # NCHW, small: batch=2, channels=4, spatial=16x16
    x = jax.random.normal(kx, (2, 4, 16, 16), dtype=jnp.float32)
    y = jax.random.normal(ky, (2, 4, 16, 16), dtype=jnp.float32)

    loss = mse_pallas(x, y, normalization=True)
    jax.block_until_ready(loss)

    # Pure-JAX reference check (same math as the PyTorch module).
    xr = (x + 1.0) / 2.0 * 255.0
    yr = (y + 1.0) / 2.0 * 255.0
    ref = jnp.mean((xr - yr) ** 2)
    assert jnp.allclose(loss, ref, rtol=1e-5, atol=1e-3), (loss, ref)

    print("KERNEL_OK")
</pallas_src>

<mosaic_0001>
module attributes {stable_mosaic.version = 11 : i64} {
  func.func @_mse_kernel(%arg0: i32, %arg1: i32, %arg2: memref<16x128xf32, #tpu.memory_space<vmem>>, %arg3: memref<16x128xf32, #tpu.memory_space<vmem>>, %arg4: memref<1x1x1xf32, #tpu.memory_space<vmem>>, %arg5: memref<1x8x128xf32, #tpu.memory_space<vmem>>) attributes {dimension_semantics = [#tpu.dimension_semantics<parallel>, #tpu.dimension_semantics<arbitrary>], iteration_bounds = array<i64: 1, 1>, scalar_prefetch = 0 : i64, scratch_operands = 1 : i64, tpu.core_type = #tpu.core_type<tc>, window_params = [{transform_indices = @transform_0, window_bounds = array<i64: 16, 128>}, {transform_indices = @transform_1, window_bounds = array<i64: 16, 128>}, {transform_indices = @transform_2, window_bounds = array<i64: 1, 1, 1>}]} {
    %c0_i32 = arith.constant 0 : i32
    %0 = arith.cmpi eq, %arg1, %c0_i32 : i32
    %1 = arith.extui %0 : i1 to i32
    %c0_i32_0 = arith.constant 0 : i32
    %2 = arith.cmpi ne, %1, %c0_i32_0 : i32
    scf.if %2 {
      %cst = arith.constant 0.000000e+00 : f32
      %18 = vector.broadcast %cst : f32 to vector<8x128xf32>
      %19 = arith.index_cast %arg0 : i32 to index
      %c0_10 = arith.constant 0 : index
      %c0_11 = arith.constant 0 : index
      %20 = vector.load %arg5[%19, %c0_10, %c0_11] : memref<1x8x128xf32, #tpu.memory_space<vmem>>, vector<1x8x128xf32>
      %21 = vector.shape_cast %20 : vector<1x8x128xf32> to vector<8x128xf32>
      %22 = vector.shape_cast %18 : vector<8x128xf32> to vector<1x8x128xf32>
      tpu.vector_store %arg5[%19, %c0_10, %c0_11], %22 {strides = array<i32>} : memref<1x8x128xf32, #tpu.memory_space<vmem>>, vector<1x8x128xf32>,
    } else {
    }
    %c0 = arith.constant 0 : index
    %c0_1 = arith.constant 0 : index
    %3 = vector.load %arg2[%c0, %c0_1] : memref<16x128xf32, #tpu.memory_space<vmem>>, vector<16x128xf32>
    %c0_2 = arith.constant 0 : index
    %c0_3 = arith.constant 0 : index
    %4 = vector.load %arg3[%c0_2, %c0_3] : memref<16x128xf32, #tpu.memory_space<vmem>>, vector<16x128xf32>
    %5 = arith.subf %3, %4 : vector<16x128xf32>
    %6 = arith.mulf %5, %5 : vector<16x128xf32>
    %c1_i32 = arith.constant 1 : i32
    %7 = arith.muli %arg0, %c1_i32 : i32
    %8 = arith.addi %7, %arg1 : i32
    %c1_i32_4 = arith.constant 1 : i32
    %9 = arith.cmpi slt, %8, %c1_i32_4 : i32
    %10 = arith.extui %9 : i1 to i32
    %c0_i32_5 = arith.constant 0 : i32
    %11 = arith.cmpi ne, %10, %c0_i32_5 : i32
    scf.if %11 {
      %18 = arith.index_cast %arg0 : i32 to index
      %c0_10 = arith.constant 0 : index
      %c0_11 = arith.constant 0 : index
      %19 = vector.load %arg5[%18, %c0_10, %c0_11] : memref<1x8x128xf32, #tpu.memory_space<vmem>>, vector<1x8x128xf32>
      %20 = vector.shape_cast %19 : vector<1x8x128xf32> to vector<8x128xf32>
      %21 = vector.shape_cast %6 : vector<16x128xf32> to vector<2x8x128xf32>
      %cst = arith.constant dense<0.000000e+00> : vector<8x128xf32>
      %22 = vector.multi_reduction <add>, %21, %cst [0] : vector<2x8x128xf32> to vector<8x128xf32>
      %23 = arith.addf %20, %22 : vector<8x128xf32>
      %24 = arith.index_cast %arg0 : i32 to index
      %c0_12 = arith.constant 0 : index
      %c0_13 = arith.constant 0 : index
      %25 = vector.load %arg5[%24, %c0_12, %c0_13] : memref<1x8x128xf32, #tpu.memory_space<vmem>>, vector<1x8x128xf32>
      %26 = vector.shape_cast %25 : vector<1x8x128xf32> to vector<8x128xf32>
      %27 = vector.shape_cast %23 : vector<8x128xf32> to vector<1x8x128xf32>
      tpu.vector_store %arg5[%24, %c0_12, %c0_13], %27 {strides = array<i32>} : memref<1x8x128xf32, #tpu.memory_space<vmem>>, vector<1x8x128xf32>,
    } else {
    }
    %c1_i32_6 = arith.constant 1 : i32
    %12 = arith.cmpi sge, %8, %c1_i32_6 : i32
    %13 = arith.extui %12 : i1 to i32
    %c0_i32_7 = arith.constant 0 : i32
    %14 = arith.cmpi ne, %13, %c0_i32_7 : i32
    scf.if %14 {
      %c16_i32 = arith.constant 16 : i32
      %18 = arith.muli %8, %c16_i32 : i32
      %c16_i32_10 = arith.constant 16 : i32
      %19 = arith.subi %c16_i32_10, %18 : i32
      %20 = tpu.iota {dimensions = array<i32: 0>} : vector<16x128xi32>
      %21 = arith.index_cast %arg0 : i32 to index
      %c0_11 = arith.constant 0 : index
      %c0_12 = arith.constant 0 : index
      %22 = vector.load %arg5[%21, %c0_11, %c0_12] : memref<1x8x128xf32, #tpu.memory_space<vmem>>, vector<1x8x128xf32>
      %23 = vector.shape_cast %22 : vector<1x8x128xf32> to vector<8x128xf32>
      %24 = vector.broadcast %19 : i32 to vector<16x128xi32>
      %25 = arith.cmpi slt, %20, %24 : vector<16x128xi32>
      %cst = arith.constant 0.000000e+00 : f32
      %26 = vector.broadcast %cst : f32 to vector<16x128xf32>
      %27 = arith.select %25, %6, %26 : vector<16x128xi1>, vector<16x128xf32>
      %28 = vector.shape_cast %27 : vector<16x128xf32> to vector<2x8x128xf32>
      %cst_13 = arith.constant dense<0.000000e+00> : vector<8x128xf32>
      %29 = vector.multi_reduction <add>, %28, %cst_13 [0] : vector<2x8x128xf32> to vector<8x128xf32>
      %30 = arith.addf %23, %29 : vector<8x128xf32>
      %31 = arith.index_cast %arg0 : i32 to index
      %c0_14 = arith.constant 0 : index
      %c0_15 = arith.constant 0 : index
      %32 = vector.load %arg5[%31, %c0_14, %c0_15] : memref<1x8x128xf32, #tpu.memory_space<vmem>>, vector<1x8x128xf32>
      %33 = vector.shape_cast %32 : vector<1x8x128xf32> to vector<8x128xf32>
      %34 = vector.shape_cast %30 : vector<8x128xf32> to vector<1x8x128xf32>
      tpu.vector_store %arg5[%31, %c0_14, %c0_15], %34 {strides = array<i32>} : memref<1x8x128xf32, #tpu.memory_space<vmem>>, vector<1x8x128xf32>,
    } else {
    }
    %c0_i32_8 = arith.constant 0 : i32
    %15 = arith.cmpi eq, %arg1, %c0_i32_8 : i32
    %16 = arith.extui %15 : i1 to i32
    %c0_i32_9 = arith.constant 0 : i32
    %17 = arith.cmpi ne, %16, %c0_i32_9 : i32
    scf.if %17 {
      %18 = arith.index_cast %arg0 : i32 to index
      %c0_10 = arith.constant 0 : index
      %c0_11 = arith.constant 0 : index
      %19 = vector.load %arg5[%18, %c0_10, %c0_11] : memref<1x8x128xf32, #tpu.memory_space<vmem>>, vector<1x8x128xf32>
      %20 = vector.shape_cast %19 : vector<1x8x128xf32> to vector<8x128xf32>
      %21 = vector.shape_cast %20 : vector<8x128xf32> to vector<1x8x128xf32>
      %cst = arith.constant dense<0.000000e+00> : vector<1xf32>
      %22 = vector.multi_reduction <add>, %21, %cst [1, 2] : vector<1x8x128xf32> to vector<1xf32>
      %23 = vector.shape_cast %22 : vector<1xf32> to vector<1x1x1xf32>
      %24 = vector.extract %23[0, 0, 0] : f32 from vector<1x1x1xf32>
      %cst_12 = arith.constant 7.93762207 : f32
      %25 = arith.mulf %24, %cst_12 : f32
      %26 = vector.broadcast %25 : f32 to vector<1x1x1xf32>
      %c0_13 = arith.constant 0 : index
      %c0_14 = arith.constant 0 : index
      %c0_15 = arith.constant 0 : index
      %27 = vector.load %arg4[%c0_13, %c0_14, %c0_15] : memref<1x1x1xf32, #tpu.memory_space<vmem>>, vector<1x1x1xf32>
      tpu.vector_store %arg4[%c0_13, %c0_14, %c0_15], %26 {strides = array<i32>} : memref<1x1x1xf32, #tpu.memory_space<vmem>>, vector<1x1x1xf32>,
    } else {
    }
    return
  }
  func.func @transform_0(%arg0: i32, %arg1: i32) -> (i32, i32) {
    %c1_i32 = arith.constant 1 : i32
    %0 = arith.muli %arg0, %c1_i32 : i32
    %1 = arith.addi %0, %arg1 : i32
    %c0_i32 = arith.constant 0 : i32
    %2 = arith.minsi %1, %c0_i32 : i32
    %c0_i32_0 = arith.constant 0 : i32
    %c0_i32_1 = arith.constant 0 : i32
    return %2, %c0_i32_0 : i32, i32
  }
  func.func @transform_1(%arg0: i32, %arg1: i32) -> (i32, i32) {
    %c1_i32 = arith.constant 1 : i32
    %0 = arith.muli %arg0, %c1_i32 : i32
    %1 = arith.addi %0, %arg1 : i32
    %c0_i32 = arith.constant 0 : i32
    %2 = arith.minsi %1, %c0_i32 : i32
    %c0_i32_0 = arith.constant 0 : i32
    %c0_i32_1 = arith.constant 0 : i32
    return %2, %c0_i32_0 : i32, i32
  }
  func.func @transform_2(%arg0: i32, %arg1: i32) -> (i32, i32, i32) {
    %c0_i32 = arith.constant 0 : i32
    %c0_i32_0 = arith.constant 0 : i32
    %c0_i32_1 = arith.constant 0 : i32
    return %arg0, %c0_i32, %c0_i32_0 : i32, i32, i32
  }
}

</mosaic_0001>

<bundles_post_ra>
// kernel: tpu_custom_call.1
= control target key start
LH: loop header
LB: loop body
LE: loop exit
PB: predicated region body
PF: predicated region fallthrough
CT: control target
= control target key end

     0   :  { %7 = vsyncpa [#allocation4], 0  ;;  %s247_s0 = inlined_call_operand.hbm [shape: f32[16,128], index: 0, kind: input, shape index: {}]   ;;  %s248_s1 = inlined_call_operand.hbm [shape: f32[16,128], index: 1, kind: input, shape index: {}]   ;;  %s249_s2 = inlined_call_operand.hbm [shape: f32[1,1,1], index: 2, kind: output, shape index: {}]  }
   0x1   :  { %8 = vsyncpa [#allocation7], 0 }
   0x2   :  { %9 = vsyncpa [#allocation5], 0  ;;  %s218_s9 = smov [#allocation3]  }
   0x3   :  { %s21_s10 = sshll.u32 %s218_s9, 4  ;;  %s22_s10 = int_to_ptr.vmem [resolvable:$true] %s21_s10 }
   0x4   :  { %s160_s11 = scalar_lea.vmem %s22_s10, 256  ;;  %p165_p1 = scmp.lt.s32.totalorder %s22_s10, %s22_s10 }
   0x5   :  { %p161_p0 = scmp.ne.s32.totalorder %s22_s10, %s160_s11  ;;  %p166_p2 = scmp.lt.s32.totalorder %s160_s11, %s160_s11 }
   0x7   :  { %p167_p3 = por %p166_p2, %p165_p1 }
   0x9   :  { %p168_p4 = pnand %p167_p3, %p161_p0 }
   0xb   :  { %171 = shalt.err (!%p168_p4)
}
   0xc   :  { %s219_s12 = smov 128   ;;  %s220_s13 = smov 8  }
   0xd   :  { %27 = dma.hbm_to_vmem [thread:$0]  %s247_s0, 256, %s22_s10, [#allocation4], %s219_s12, %s219_s12, %s220_s13  }
   0xe   :  { %s221_s16 = smov [#allocation6]  }
   0xf   :  { %s39_s17 = sshll.u32 %s221_s16, 4  ;;  %s40_s17 = int_to_ptr.vmem [resolvable:$true] %s39_s17 }
  0x10   :  { %s180_s18 = scalar_lea.vmem %s40_s17, 256  ;;  %p185_p6 = scmp.lt.s32.totalorder %s40_s17, %s40_s17 }
  0x11   :  { %p181_p5 = scmp.ne.s32.totalorder %s40_s17, %s180_s18  ;;  %p186_p7 = scmp.lt.s32.totalorder %s180_s18, %s180_s18 }
  0x13   :  { %p187_p8 = por %p186_p7, %p185_p6 }
  0x15   :  { %p188_p9 = pnand %p187_p8, %p181_p5 }
  0x17   :  { %191 = shalt.err (!%p188_p9)
}
  0x18   :  { %45 = dma.hbm_to_vmem [thread:$0]  %s248_s1, 256, %s40_s17, [#allocation7], %s219_s12, %s219_s12, %s220_s13  }
  0x19   :  { %212 = dma.done.wait [#allocation4], 256  }
  0x1a   :  { %213 = vsyncadd [#allocation4], 4294967040 }
  0x1b   :  { %214 = dma.done.wait [#allocation7], 256  }
  0x1c   :  { %215 = vsyncadd [#allocation7], 4294967040  ;;  %v67_v0 = vld [vmem:[#allocation3] sm:$0xff]  ;;  %v68_v1 = vld [vmem:[#allocation3 + $0x8] sm:$0xff]  ;;  %s222_s0 = smov [#allocation8]   ;;  %vm123_vm0 = vcmask 0  }
  0x1d   :  { %v69_v2 = vld [vmem:[#allocation6] sm:$0xff]  ;;  %v70_v3 = vld [vmem:[#allocation6 + $0x8] sm:$0xff]  ;;  %s131_s1 = sshll.u32 %s222_s0, 4  ;;  %s132_s1 = int_to_ptr.vmem [resolvable:$true] %s131_s1 }
  0x1e   :  { %v71_v4 = vsub.f32 %v67_v0, %v69_v2  ;;  %v72_v5 = vsub.f32 %v68_v1, %v70_v3  ;;  %s192_s23 = scalar_lea.vmem %s132_s1, 16  ;;  %s196_s24 = scalar_lea.vmem %s132_s1, 32 }
  0x1f   :  { %p193_p10 = scmp.ne.s32.totalorder %s132_s1, %s192_s23  ;;  %p197_p11 = scmp.lt.s32.totalorder %s132_s1, %s132_s1 }
  0x20   :  { %v73_v6 = vmul.f32 %v71_v4, %v71_v4  ;;  %v74_v7 = vmul.f32 %v72_v5, %v72_v5  ;;  %p198_p12 = scmp.lt.s32.totalorder %s196_s24, %s192_s23 }
  0x22   :  { %v83_v8 = vadd.f32 %v74_v7, %v73_v6  ;;  %p199_p13 = por %p198_p12, %p197_p11 }
  0x24   :  { %112 = vadd.xlane.f32.xlu0 %v83_v8  ;;  %p200_p0 = pnand %p199_p13, %p193_p10 }
  0xad   :  { %v113_v9 = vpop.xlane.xlu0 %112 }
  0xae   :  { %v114_v10 = vrot.slane %v113_v9, 4 }
  0xb0   :  { %v115_v11 = vadd.f32 %v114_v10, %v113_v9 }
  0xb2   :  { %v116_v12 = vrot.slane %v115_v11, 2 }
  0xb4   :  { %v117_v13 = vadd.f32 %v116_v12, %v115_v11 }
  0xb6   :  { %v118_v14 = vrot.slane %v117_v13, 1 }
  0xb8   :  { %v119_v15 = vadd.f32 %v118_v14, %v117_v13 }
  0xba   :  { %145 = vpush %v119_v15 }
  0xeb   :  { %s146_s21 = spop %145 }
  0xec   :  { %s121_s22 = smul.f32 7.937622, %s146_s21 }
  0xee   :  { %v122_v16 = vstv %s121_s22 }
  0xef   :  { %124 = vst.msk [vmem:[#allocation8] sm:$0x1] %vm123_vm0, %v122_v16 }
  0xf0   :  { %203 = shalt.err (!%p200_p0)
}
  0xf1   :  { %134 = dma.vmem_to_hbm [thread:$0]  %s132_s1, 16, %s249_s2, [#allocation5]  }
  0xf2   :  { %216 = dma.done.wait [#allocation5], 16  }
  0xf3   :  { %217 = vsyncadd [#allocation5], 4294967280 }
  0xf4   :  { %138 = vsyncpa [#allocation4], 1 }
  0xf5   :  { %139 = vsyncpa [#allocation7], 1 }
  0xf6   :  { %140 = vsyncpa [#allocation5], 1 }

</bundles_post_ra>
